<compile_context>
chip_gen: v7x
topology: tpu7x:2x2x1
jax: 0.10.0
libtpu: 0.0.40
codegen_flags: <defaults>
</compile_context>

<pallas_src>
import functools

import numpy as np
import jax
import jax.numpy as jnp
from jax.experimental import pallas as pl
from jax.experimental.pallas import tpu as pltpu


# ---------------------------------------------------------------------------
# Generation-aware VMEM budget + tiling helpers
# ---------------------------------------------------------------------------

@functools.lru_cache(None)
def _vmem_budget_bytes():
    """~75% of physical VMEM; conservative (v7x-sized) fallback if query fails."""
    try:
        cap = int(pltpu.get_tpu_info().vmem_capacity_bytes)
    except Exception:
        cap = 64 * 1024 * 1024
    return max(32 * 1024 * 1024, min((cap * 3) // 4, 112 * 1024 * 1024))


def _round_up(x, m):
    return ((x + m - 1) // m) * m


def _pick_tile(dim_padded, pref):
    """Largest multiple of 128 that is <= pref and divides dim_padded."""
    t = min(pref, dim_padded)
    t -= t % 128
    t = max(t, 128)
    while dim_padded % t != 0:
        t -= 128
    return t


def _prop_tiles(npad, fpad, budget):
    """A-tile sizes for propagation, scaled to the per-generation VMEM budget."""
    tm_pref, tk_pref = (1024, 2048) if budget >= (80 << 20) else (512, 1024)
    tm = _pick_tile(npad, tm_pref)
    tk = _pick_tile(npad, tk_pref)

    def est(tm, tk):
        return (4 * tm * tk          # A_hat bf16 tiles, double buffered
                + 4 * tk * fpad      # bf16 hop-state tiles, double buffered
                + 8 * tm * fpad      # f32 x0 tiles, double buffered
                + 8 * tm * fpad      # f32 output tiles, double buffered
                + 4 * tm * fpad)     # f32 accumulator scratch

    while est(tm, tk) > budget and (tm > 128 or tk > 128):
        if tk >= tm and tk > 128:
            tk = _pick_tile(npad, tk - 128)
        elif tm > 128:
            tm = _pick_tile(npad, tm - 128)
        else:
            break
    return tm, tk


def _mm_tiles(mp, np2, kp, budget, *, square_reg):
    """Output/contraction tiles for the A @ B^T kernel."""
    tpref = 1024 if budget >= (80 << 20) else 512
    tm = _pick_tile(mp, tpref)
    tn = _pick_tile(np2, tpref)
    if square_reg:
        tm = tn = min(tm, tn)
    tk = kp if kp <= 2048 else _pick_tile(kp, 2048)

    def est(tm, tn, tk):
        multi = (kp // tk) > 1
        # bytes are identical for f32 (1 array x 4B) and hi/lo bf16 (2 arrays x 2B)
        return (8 * tm * tk + 8 * tn * tk + 8 * tm * tn
                + (4 * tm * tn if multi else 0))

    while est(tm, tn, tk) > budget and (tm > 128 or tn > 128 or tk > 512):
        if tk > 512 and tk >= max(tm, tn):
            tk = _pick_tile(kp, max(512, tk - 128))
        elif tm >= tn and tm > 128:
            tm = _pick_tile(mp, tm - 128)
            if square_reg:
                tn = tm
        elif tn > 128:
            tn = _pick_tile(np2, tn - 128)
        else:
            break
    return tm, tn, tk


# ---------------------------------------------------------------------------
# Pallas kernels
# ---------------------------------------------------------------------------

def _prop_hop_kernel(a_ref, xb_ref, x0_ref, o_ref, acc_ref, *, alpha):
    """One propagation hop.

      SGC   : x <- A_hat @ x
      APPNP : x <- (1 - alpha) * (A_hat @ x) + alpha * x0

    grid = (Np // tm, Np // tk), i "parallel" (megacore / both v7x TCs),
    k "arbitrary" (reduction, innermost).

    a_ref  : (tm, tk)  bf16 tile of A_hat at block (i, k)
    xb_ref : (tk, Fp)  bf16 tile of the current hop state (cast once per hop
                       in the wrapper -> no per-(i,k) VALU recast)
    x0_ref : (tm, Fp)  f32 tile of the original features (APPNP teleport term)
    o_ref  : (tm, Fp)  f32 output tile (next hop state), block (i, 0)
    acc_ref: (tm, Fp)  f32 accumulator scratch
    """
    k = pl.program_id(1)
    nk = pl.num_programs(1)

    @pl.when(k == 0)
    def _():
        acc_ref[...] = jnp.zeros_like(acc_ref)

    acc_ref[...] += jnp.dot(a_ref[...], xb_ref[...],
                            preferred_element_type=jnp.float32)

    @pl.when(k == nk - 1)
    def _():
        if alpha is None:                                   # SGC
            o_ref[...] = acc_ref[...]
        else:                                               # APPNP
            o_ref[...] = (1.0 - alpha) * acc_ref[...] + alpha * x0_ref[...]


def _mm_nt_kernel(*refs, lam, split, multi_k):
    """Tiled  O = A @ B^T  (+ lam * I on diagonal output tiles only).

    Contracts the LAST dim of both operands (dot_general, no in-kernel
    transpose).  When `split`, operands arrive as hi/lo bf16 pairs and the
    product is hi*hi + hi*lo + lo*hi (3 bf16 MXU passes, ~f32 accuracy).
    When `multi_k` is False (K fits one tile) there is NO accumulator scratch
    and the result (incl. lam*I) is written in a single store.
    """
    if multi_k:
        in_refs, o_ref, acc_ref = refs[:-2], refs[-2], refs[-1]
    else:
        in_refs, o_ref = refs[:-1], refs[-1]

    dn = (((1,), (1,)), ((), ()))

    def prod():
        if split:
            a_hi, a_lo, b_hi, b_lo = in_refs
            p = jax.lax.dot_general(a_hi[...], b_hi[...], dn,
                                    preferred_element_type=jnp.float32)
            p += jax.lax.dot_general(a_hi[...], b_lo[...], dn,
                                     preferred_element_type=jnp.float32)
            p += jax.lax.dot_general(a_lo[...], b_hi[...], dn,
                                     preferred_element_type=jnp.float32)
            return p
        a, b = in_refs
        return jax.lax.dot_general(a[...], b[...], dn,
                                   preferred_element_type=jnp.float32)

    def write(res):
        if lam == 0.0:
            o_ref[...] = res
        else:
            on_diag = pl.program_id(0) == pl.program_id(1)

            @pl.when(on_diag)
            def _():
                r = jax.lax.broadcasted_iota(jnp.int32, o_ref.shape, 0)
                c = jax.lax.broadcasted_iota(jnp.int32, o_ref.shape, 1)
                o_ref[...] = res + lam * (r == c).astype(jnp.float32)

            @pl.when(jnp.logical_not(on_diag))
            def _():
                o_ref[...] = res

    if not multi_k:
        write(prod())
    else:
        k = pl.program_id(2)
        nk = pl.num_programs(2)

        @pl.when(k == 0)
        def _():
            acc_ref[...] = jnp.zeros_like(acc_ref)

        acc_ref[...] += prod()

        @pl.when(k == nk - 1)
        def _():
            write(acc_ref[...])


# ---------------------------------------------------------------------------
# pallas_call wrappers
# ---------------------------------------------------------------------------

def _propagate(a_hat_p, x, *, k_hop, alpha):
    """K-hop SGC / APPNP propagation: one pallas_call per hop (i axis parallel).

    a_hat_p : (Np, Np) bf16, already padded.
    x       : (N, F) f32.
    """
    n, f = x.shape
    npad = a_hat_p.shape[0]
    fpad = _round_up(f, 128)                      # lane-dense output (>= 128 wide)
    budget = _vmem_budget_bytes()
    tm, tk = _prop_tiles(npad, fpad, budget)

    x0_p = jnp.zeros((npad, fpad), jnp.float32).at[:n, :f].set(
        x.astype(jnp.float32))

    call = pl.pallas_call(
        functools.partial(_prop_hop_kernel, alpha=alpha),
        out_shape=jax.ShapeDtypeStruct((npad, fpad), jnp.float32),
        grid=(npad // tm, npad // tk),
        in_specs=[pl.BlockSpec((tm, tk), lambda i, k: (i, k)),
                  pl.BlockSpec((tk, fpad), lambda i, k: (k, 0)),
                  pl.BlockSpec((tm, fpad), lambda i, k: (i, 0))],
        out_specs=pl.BlockSpec((tm, fpad), lambda i, k: (i, 0)),
        scratch_shapes=[pltpu.VMEM((tm, fpad), jnp.float32)],
        compiler_params=pltpu.CompilerParams(
            dimension_semantics=("parallel", "arbitrary"),
            vmem_limit_bytes=budget),
        cost_estimate=pl.CostEstimate(
            flops=2 * npad * npad * fpad,
            transcendentals=0,
            bytes_accessed=npad * npad * 2 + npad * fpad * (2 + 4 + 4)),
    )

    state = x0_p
    for _ in range(k_hop):
        # bf16 cast of the hop state happens ONCE per hop (hoisted out of the grid).
        state = call(a_hat_p, state.astype(jnp.bfloat16), x0_p)
    return state[:n, :f]


def _split_hi_lo(x):
    hi = x.astype(jnp.bfloat16)
    lo = (x - hi.astype(jnp.float32)).astype(jnp.bfloat16)
    return hi, lo


def _matmul_nt(a, b, *, lam=0.0, precision="bf16x3"):
    """(M, K) @ (N, K)^T -> (M, N) f32 on the MXU, + lam*I on the diagonal.

    precision:
      "f32"    - f32 operands (used for the Gram feeding the SPD solve)
      "bf16x3" - hi/lo bf16 split per operand, 3 bf16 MXU passes, f32 accumulation
    """
    m, ka = a.shape
    n2, kb = b.shape
    assert ka == kb
    same = a is b
    split = (precision == "bf16x3")

    mp = _round_up(m, 128)
    np2 = _round_up(n2, 128)
    kp = _round_up(ka, 128)
    budget = _vmem_budget_bytes()
    tm, tn, tk = _mm_tiles(mp, np2, kp, budget, square_reg=(lam != 0.0))
    if lam != 0.0:
        assert mp == np2 and tm == tn      # diagonal-tile regularizer needs square tiles
    multi_k = (kp // tk) > 1

    def pad(x, rows, kcols):
        return jnp.zeros((rows, kp), jnp.float32).at[:x.shape[0], :kcols].set(
            x.astype(jnp.float32))

    a_p = pad(a, mp, ka)
    b_p = a_p if same else pad(b, np2, kb)        # Gram reuses one padded operand

    if split:
        a_ops = _split_hi_lo(a_p)
        b_ops = a_ops if same else _split_hi_lo(b_p)
        operands = (a_ops[0], a_ops[1], b_ops[0], b_ops[1])
    else:
        operands = (a_p, b_p)
    n_per_side = 2 if split else 1

    if multi_k:
        grid = (mp // tm, np2 // tn, kp // tk)
        a_map = lambda i, j, k: (i, k)
        b_map = lambda i, j, k: (j, k)
        o_map = lambda i, j, k: (i, j)
        scratch = [pltpu.VMEM((tm, tn), jnp.float32)]
        dims = ("parallel", "parallel", "arbitrary")
    else:
        grid = (mp // tm, np2 // tn)
        a_map = lambda i, j: (i, 0)
        b_map = lambda i, j: (j, 0)
        o_map = lambda i, j: (i, j)
        scratch = []
        dims = ("parallel", "parallel")

    in_specs = ([pl.BlockSpec((tm, tk), a_map)] * n_per_side
                + [pl.BlockSpec((tn, tk), b_map)] * n_per_side)

    op_bytes = 4                                   # f32, or 2 x bf16 hi/lo
    out = pl.pallas_call(
        functools.partial(_mm_nt_kernel, lam=float(lam), split=split,
                          multi_k=multi_k),
        out_shape=jax.ShapeDtypeStruct((mp, np2), jnp.float32),
        grid=grid,
        in_specs=in_specs,
        out_specs=pl.BlockSpec((tm, tn), o_map),
        scratch_shapes=scratch,
        compiler_params=pltpu.CompilerParams(
            dimension_semantics=dims, vmem_limit_bytes=budget),
        cost_estimate=pl.CostEstimate(
            flops=2 * mp * np2 * kp * (3 if split else 1),
            transcendentals=0,
            bytes_accessed=(mp + np2) * kp * op_bytes + mp * np2 * 4),
    )(*operands)
    return out[:m, :n2]


# ---------------------------------------------------------------------------
# Glue: gcn_norm as a dense, padded, bf16 normalized adjacency (PyG semantics)
# ---------------------------------------------------------------------------

def gcn_norm_dense(edge_index, num_nodes, npad, edge_weight=None):
    """D^-1/2 (A + I) D^-1/2, built directly at the padded size as bf16.

    A[dst, src] = w so that "source_to_target" aggregation is exactly A_hat @ X.
    Padding rows/cols stay exactly zero (self-loops only on real nodes).
    """
    src = edge_index[0]
    dst = edge_index[1]
    if edge_weight is None:
        edge_weight = jnp.ones(src.shape, jnp.float32)
    a = jnp.zeros((npad, npad), jnp.float32).at[dst, src].add(
        edge_weight.astype(jnp.float32))
    idx = jnp.arange(num_nodes)
    a = a.at[idx, idx].add(1.0)                    # add_self_loops, fill value 1
    deg = a.sum(axis=1)                            # scatter_add over col (= dst)
    dinv = jnp.where(deg > 0, jax.lax.rsqrt(deg), 0.0)
    a = dinv[:, None] * a * dinv[None, :]
    return a.astype(jnp.bfloat16)


# ---------------------------------------------------------------------------
# UnFLGC
# ---------------------------------------------------------------------------

class UnFLGCPallas:
    def __init__(self, n_clusters, agg='appnp', regularization_coef=1e-05,
                 K_hop=1, ro=0.8, save_affinity=False, **kwargs):
        self.n_clusters = n_clusters
        self.regularization_coef = float(regularization_coef)
        self.K_hop = int(K_hop)
        self.ro = ro
        self.agg = agg
        if self.agg == 'sgc':
            self.alpha = None
        elif self.agg == 'appnp':
            self.alpha = float(kwargs.get('alpha', 0.1))
        else:
            raise Exception('no such aggregation!')
        self.save_affinity = save_affinity
        self.kwargs = kwargs

    # graph aggregation (MySGConv / PageRankAgg) — per-hop Pallas matmul kernel
    def aggregate(self, x, edge_index, edge_weight=None):
        x = jnp.asarray(x, jnp.float32)
        if self.K_hop <= 0:
            return x
        n = x.shape[0]
        npad = _round_up(n, 128)
        a_hat = gcn_norm_dense(edge_index, n, npad, edge_weight)
        return _propagate(a_hat, x, k_hop=self.K_hop, alpha=self.alpha)

    def cal_closed_form_solution(self, x_gconv, x_node):
        x_gconv = jnp.asarray(x_gconv, jnp.float32)
        x_node = jnp.asarray(x_node, jnp.float32)
        # G = Xg @ Xg^T + lam * I.  Kept in f32: G has rank <= F << N and
        # lam = 1e-5 barely regularizes it, so bf16-class operand error can push
        # the smallest eigenvalue of G + lam*I negative and break the Cholesky.
        gram = _matmul_nt(x_gconv, x_gconv,
                          lam=self.regularization_coef, precision="f32")
        # TODO(synk): Cholesky factor / triangular solve have no Pallas primitive;
        # the SPD solve (numerically safer than an explicit inverse) stays in XLA.
        c_and_lower = jax.scipy.linalg.cho_factor(gram)
        y = jax.scipy.linalg.cho_solve(c_and_lower, x_gconv)     # = G^{-1} @ Xg
        # S = (G^{-1} Xg) @ Xn^T — hi/lo bf16 split: bf16 MXU throughput with
        # ~f32 accuracy (avoids the plain-bf16 perturbation of S flagged in review).
        return _matmul_nt(y, x_node, lam=0.0, precision="bf16x3")

    def forward(self, x, edge_index, edge_attr=None):
        x_gconv = self.aggregate(x, edge_index, edge_attr)
        closed_form_solution = self.cal_closed_form_solution(x_gconv, x)
        self.closed_form_solution = closed_form_solution
        Coef = self.thrC(np.asarray(closed_form_solution), self.ro)
        # TODO(synk): post_proC (scipy.sparse.linalg.svds + sklearn SpectralClustering)
        # has no Pallas/JAX equivalent; returning the closed-form solution and the
        # thresholded coefficient matrix instead of discrete cluster labels.
        return closed_form_solution, Coef

    @staticmethod
    def thrC(C, ro):
        # verbatim numpy post-processing from the reference module
        if ro < 1:
            N = C.shape[1]
            Cp = np.zeros((N, N))
            S = np.abs(np.sort(-np.abs(C), axis=0))
            Ind = np.argsort(-np.abs(C), axis=0)
            for i in range(N):
                cL1 = np.sum(S[:, i]).astype(float)
                stop = False
                csum = 0
                t = 0
                while stop is False:
                    csum = csum + S[t, i]
                    if csum > ro * cL1:
                        stop = True
                        Cp[Ind[0:t + 1, i], i] = C[Ind[0:t + 1, i], i]
                    t = t + 1
        else:
            Cp = C
        return Cp


# ---------------------------------------------------------------------------
# Driver
# ---------------------------------------------------------------------------

if __name__ == "__main__":
    key = jax.random.PRNGKey(0)
    N, F = 64, 32           # num_nodes, num_features (small synthetic graph)
    num_edges = 128

    k_x, k_s, k_d = jax.random.split(key, 3)
    x = jax.random.normal(k_x, (N, F), dtype=jnp.float32)

    src = jax.random.randint(k_s, (num_edges,), 0, N)
    dst = jax.random.randint(k_d, (num_edges,), 0, N)
    src = jnp.where(src == dst, (src + 1) % N, src)   # no self loops in raw edges
    # make the graph undirected (both directions), int32 edge_index of shape (2, E)
    edge_index = jnp.stack([jnp.concatenate([src, dst]),
                            jnp.concatenate([dst, src])]).astype(jnp.int32)

    model = UnFLGCPallas(n_clusters=4, agg='appnp',
                         regularization_coef=1e-05, K_hop=2, ro=0.8, alpha=0.1)
    solution, coef = model.forward(x, edge_index)
    jax.block_until_ready(solution)
    assert solution.shape == (N, N) and coef.shape == (N, N)
    assert bool(jnp.all(jnp.isfinite(solution)))
    print("KERNEL_OK")
</pallas_src>

<mosaic_0001>
module attributes {stable_mosaic.version = 11 : i64} {
  func.func @_prop_hop_kernel(%arg0: i32, %arg1: i32, %arg2: memref<128x128xbf16, #tpu.memory_space<vmem>>, %arg3: memref<128x128xbf16, #tpu.memory_space<vmem>>, %arg4: memref<128x128xf32, #tpu.memory_space<vmem>>, %arg5: memref<128x128xf32, #tpu.memory_space<vmem>>, %arg6: memref<128x128xf32, #tpu.memory_space<vmem>>) attributes {dimension_semantics = [#tpu.dimension_semantics<parallel>, #tpu.dimension_semantics<arbitrary>], iteration_bounds = array<i64: 1, 1>, scalar_prefetch = 0 : i64, scratch_operands = 1 : i64, tpu.core_type = #tpu.core_type<tc>, window_params = [{transform_indices = @transform_0, window_bounds = array<i64: 128, 128>}, {transform_indices = @transform_1, window_bounds = array<i64: 128, 128>}, {transform_indices = @transform_2, window_bounds = array<i64: 128, 128>}, {transform_indices = @transform_3, window_bounds = array<i64: 128, 128>}]} {
    %c0_i32 = arith.constant 0 : i32
    %0 = arith.cmpi eq, %arg1, %c0_i32 : i32
    %1 = arith.extui %0 : i1 to i32
    %c0_i32_0 = arith.constant 0 : i32
    %2 = arith.cmpi ne, %1, %c0_i32_0 : i32
    scf.if %2 {
      %cst_10 = arith.constant 0.000000e+00 : f32
      %12 = vector.broadcast %cst_10 : f32 to vector<128x128xf32>
      %c0_11 = arith.constant 0 : index
      %c0_12 = arith.constant 0 : index
      %13 = vector.load %arg6[%c0_11, %c0_12] : memref<128x128xf32, #tpu.memory_space<vmem>>, vector<128x128xf32>
      tpu.vector_store %arg6[%c0_11, %c0_12], %12 {strides = array<i32>} : memref<128x128xf32, #tpu.memory_space<vmem>>, vector<128x128xf32>,
    } else {
    }
    %c0 = arith.constant 0 : index
    %c0_1 = arith.constant 0 : index
    %3 = vector.load %arg6[%c0, %c0_1] : memref<128x128xf32, #tpu.memory_space<vmem>>, vector<128x128xf32>
    %c0_2 = arith.constant 0 : index
    %c0_3 = arith.constant 0 : index
    %4 = vector.load %arg2[%c0_2, %c0_3] : memref<128x128xbf16, #tpu.memory_space<vmem>>, vector<128x128xbf16>
    %c0_4 = arith.constant 0 : index
    %c0_5 = arith.constant 0 : index
    %5 = vector.load %arg3[%c0_4, %c0_5] : memref<128x128xbf16, #tpu.memory_space<vmem>>, vector<128x128xbf16>
    %cst = arith.constant dense<0.000000e+00> : vector<128x128xf32>
    %6 = tpu.matmul %4, %5, %cst {dimension_numbers = #tpu.dot_dimension_numbers<[1], [0], [0], [1], [0, 0, 1, 1], [], []>} : vector<128x128xbf16>, vector<128x128xbf16>, vector<128x128xf32> -> vector<128x128xf32>
    %7 = arith.addf %3, %6 : vector<128x128xf32>
    %c0_6 = arith.constant 0 : index
    %c0_7 = arith.constant 0 : index
    %8 = vector.load %arg6[%c0_6, %c0_7] : memref<128x128xf32, #tpu.memory_space<vmem>>, vector<128x128xf32>
    tpu.vector_store %arg6[%c0_6, %c0_7], %7 {strides = array<i32>} : memref<128x128xf32, #tpu.memory_space<vmem>>, vector<128x128xf32>,
    %c0_i32_8 = arith.constant 0 : i32
    %9 = arith.cmpi eq, %arg1, %c0_i32_8 : i32
    %10 = arith.extui %9 : i1 to i32
    %c0_i32_9 = arith.constant 0 : i32
    %11 = arith.cmpi ne, %10, %c0_i32_9 : i32
    scf.if %11 {
      %c0_10 = arith.constant 0 : index
      %c0_11 = arith.constant 0 : index
      %12 = vector.load %arg6[%c0_10, %c0_11] : memref<128x128xf32, #tpu.memory_space<vmem>>, vector<128x128xf32>
      %cst_12 = arith.constant 0.899999976 : f32
      %13 = vector.broadcast %cst_12 : f32 to vector<128x128xf32>
      %14 = arith.mulf %13, %12 : vector<128x128xf32>
      %c0_13 = arith.constant 0 : index
      %c0_14 = arith.constant 0 : index
      %15 = vector.load %arg4[%c0_13, %c0_14] : memref<128x128xf32, #tpu.memory_space<vmem>>, vector<128x128xf32>
      %cst_15 = arith.constant 1.000000e-01 : f32
      %16 = vector.broadcast %cst_15 : f32 to vector<128x128xf32>
      %17 = arith.mulf %16, %15 : vector<128x128xf32>
      %18 = arith.addf %14, %17 : vector<128x128xf32>
      %c0_16 = arith.constant 0 : index
      %c0_17 = arith.constant 0 : index
      %19 = vector.load %arg5[%c0_16, %c0_17] : memref<128x128xf32, #tpu.memory_space<vmem>>, vector<128x128xf32>
      tpu.vector_store %arg5[%c0_16, %c0_17], %18 {strides = array<i32>} : memref<128x128xf32, #tpu.memory_space<vmem>>, vector<128x128xf32>,
    } else {
    }
    return
  }
  func.func @transform_0(%arg0: i32, %arg1: i32) -> (i32, i32) {
    %c0_i32 = arith.constant 0 : i32
    return %arg0, %arg1 : i32, i32
  }
  func.func @transform_1(%arg0: i32, %arg1: i32) -> (i32, i32) {
    %c0_i32 = arith.constant 0 : i32
    %c0_i32_0 = arith.constant 0 : i32
    return %arg1, %c0_i32 : i32, i32
  }
  func.func @transform_2(%arg0: i32, %arg1: i32) -> (i32, i32) {
    %c0_i32 = arith.constant 0 : i32
    %c0_i32_0 = arith.constant 0 : i32
    return %arg0, %c0_i32 : i32, i32
  }
  func.func @transform_3(%arg0: i32, %arg1: i32) -> (i32, i32) {
    %c0_i32 = arith.constant 0 : i32
    %c0_i32_0 = arith.constant 0 : i32
    return %arg0, %c0_i32 : i32, i32
  }
}

</mosaic_0001>

<bundles_post_ra>
// kernel: tpu_custom_call.1
= control target key start
LH: loop header
LB: loop body
LE: loop exit
PB: predicated region body
PF: predicated region fallthrough
CT: control target
= control target key end

     0   :  { %8 = vsyncpa [#allocation4], 0  ;;  %s754_s0 = inlined_call_operand.hbm [shape: bf16[128,128], index: 0, kind: input, shape index: {}]   ;;  %s755_s1 = inlined_call_operand.hbm [shape: bf16[128,128], index: 1, kind: input, shape index: {}]   ;;  %s756_s2 = inlined_call_operand.hbm [shape: f32[128,128], index: 2, kind: input, shape index: {}]   ;;  %s757_s3 = inlined_call_operand.hbm [shape: f32[128,128], index: 3, kind: output, shape index: {}]  }
   0x1   :  { %9 = vsyncpa [#allocation7], 0 }
   0x2   :  { %10 = vsyncpa [#allocation5], 0  ;;  %s665_s12 = smov [#allocation6]   ;;  %s666_s14 = smov [#allocation3]  }
   0x3   :  { %s28_s13 = sshll.u32 %s665_s12, 4  ;;  %s16_s15 = sshll.u32 %s666_s14, 4  ;;  %s29_s13 = int_to_ptr.vmem [resolvable:$true] %s28_s13  ;;  %s693_s15 = int_to_ptr.vmem [resolvable:$true] %s16_s15 }
   0x4   :  { %s571_s18 = scalar_lea.hbm %s755_s1, 1024 }
   0x5   :  { %p572_p0 = scmp.ne.s32.totalorder %s755_s1, %s571_s18  ;;  %p575_p1 = scmp.lt.u32.totalorder %s571_s18, %s755_s1 }
   0x7   :  { %p577_p2 = pnand %p575_p1, %p572_p0 }
   0x9   :  { %580 = shalt.err (!%p577_p2)
}
   0xa   :  { %s581_s23 = scalar_lea.vmem %s29_s13, 1024  ;;  %p586_p4 = scmp.lt.s32.totalorder %s29_s13, %s29_s13 }
   0xb   :  { %p582_p3 = scmp.ne.s32.totalorder %s29_s13, %s581_s23  ;;  %p587_p5 = scmp.lt.s32.totalorder %s581_s23, %s581_s23 }
   0xd   :  { %p588_p6 = por %p587_p5, %p586_p4 }
   0xf   :  { %p589_p7 = pnand %p588_p6, %p582_p3 }
  0x11   :  { %592 = shalt.err (!%p589_p7)
}
  0x12   :  { %s667_s24 = smov 64   ;;  %s668_s25 = smov 4  }
  0x13   :  { %34 = dma.hbm_to_vmem [thread:$0]  %s755_s1, 1024, %s29_s13, [#allocation7], %s667_s24, %s667_s24, %s668_s25  }
  0x14   :  { %s593_s30 = scalar_lea.hbm %s754_s0, 1024 }
  0x15   :  { %p594_p8 = scmp.ne.s32.totalorder %s754_s0, %s593_s30  ;;  %p597_p9 = scmp.lt.u32.totalorder %s593_s30, %s754_s0 }
  0x17   :  { %p599_p10 = pnand %p597_p9, %p594_p8 }
  0x19   :  { %602 = shalt.err (!%p599_p10)
}
  0x1a   :  { %s603_s8 = scalar_lea.vmem %s693_s15, 1024  ;;  %p608_p12 = scmp.lt.s32.totalorder %s693_s15, %s693_s15 }
  0x1b   :  { %p604_p11 = scmp.ne.s32.totalorder %s693_s15, %s603_s8  ;;  %p609_p13 = scmp.lt.s32.totalorder %s603_s8, %s603_s8 }
  0x1d   :  { %p610_p0 = por %p609_p13, %p608_p12 }
  0x1f   :  { %p611_p1 = pnand %p610_p0, %p604_p11 }
  0x21   :  { %614 = shalt.err (!%p611_p1)
}
  0x22   :  { %22 = dma.hbm_to_vmem [thread:$0]  %s754_s0, 1024, %s693_s15, [#allocation4], %s667_s24, %s667_s24, %s668_s25  }
  0x23   :  { %s669_s10 = smov [#allocation8]   ;;  %s615_s14 = scalar_lea.hbm %s756_s2, 2048 }
  0x24   :  { %s40_s11 = sshll.u32 %s669_s10, 4  ;;  %p616_p2 = scmp.ne.s32.totalorder %s756_s2, %s615_s14  ;;  %s41_s11 = int_to_ptr.vmem [resolvable:$true] %s40_s11 }
  0x25   :  { %p619_p3 = scmp.lt.u32.totalorder %s615_s14, %s756_s2 }
  0x27   :  { %p621_p4 = pnand %p619_p3, %p616_p2 }
  0x29   :  { %624 = shalt.err (!%p621_p4)
}
  0x2a   :  { %s625_s20 = scalar_lea.vmem %s41_s11, 2048  ;;  %p630_p6 = scmp.lt.s32.totalorder %s41_s11, %s41_s11 }
  0x2b   :  { %p626_p5 = scmp.ne.s32.totalorder %s41_s11, %s625_s20  ;;  %p631_p7 = scmp.lt.s32.totalorder %s625_s20, %s625_s20 }
  0x2d   :  { %p632_p8 = por %p631_p7, %p630_p6 }
  0x2f   :  { %p633_p9 = pnand %p632_p8, %p626_p5 }
  0x31   :  { %636 = shalt.err (!%p633_p9)
}
  0x32   :  { %s670_s0 = smov 128   ;;  %s671_s15 = smov 8  }
  0x33   :  { %46 = dma.hbm_to_vmem [thread:$0]  %s756_s2, 2048, %s41_s11, [#allocation7], %s670_s0, %s670_s0, %s671_s15  }
  0x34   :  { %659 = dma.done.wait [#allocation4], 1024  }
  0x35   :  { %660 = vsyncadd [#allocation4], 4294966272 }
  0x36   :  { %661 = dma.done.wait [#allocation7], 3072  }
  0x37   :  { %662 = vsyncadd [#allocation7], 4294964224  ;;  %v555_v0 = vld [vmem:[#allocation6] sm:$0xff]   ;;  %v556_v1 = vld [vmem:[#allocation6 + $0x8] sm:$0xff]   ;;  %s672_s2 = smov [#allocation9]  }
  0x38   :  { %499 = vmatprep.subr.bf16.mxu0 %v555_v0  ;;  %531 = vmatprep.subr.bf16.mxu1 %v555_v0  ;;  %v557_v2 = vld [vmem:[#allocation6 + $0x10] sm:$0xff]   ;;  %v558_v3 = vld [vmem:[#allocation6 + $0x18] sm:$0xff]   ;;  %v563_v4 = vld [vmem:[#allocation3] sm:$0xff]   ;;  %s454_s23 = sshll.u32 %s672_s2, 4  ;;  %s455_s23 = int_to_ptr.vmem [resolvable:$true] %s454_s23 }
  0x39   :  { %500 = vmatpush3.bf16.msra.mxu0 %v555_v0  ;;  %539 = vmatpush3.bf16.msra.mxu1 %v555_v0  ;;  %v564_v5 = vld [vmem:[#allocation3 + $0x20] sm:$0xff]   ;;  %v560_v7 = vld [vmem:[#allocation6 + $0x28] sm:$0xff]   ;;  %v561_v8 = vld [vmem:[#allocation6 + $0x30] sm:$0xff]   ;;  %s637_s24 = scalar_lea.vmem %s455_s23, 2048  ;;  %p642_p11 = scmp.lt.s32.totalorder %s455_s23, %s455_s23 }
  0x3a   :  { %501 = vmatprep.subr.bf16.mxu0 %v556_v1  ;;  %532 = vmatprep.subr.bf16.mxu1 %v556_v1  ;;  %v559_v6 = vld [vmem:[#allocation6 + $0x20] sm:$0xff]   ;;  %v562_v9 = vld [vmem:[#allocation6 + $0x38] sm:$0xff]   ;;  %v565_v10 = vld [vmem:[#allocation3 + $0x8] sm:$0xff]   ;;  %p638_p10 = scmp.ne.s32.totalorder %s455_s23, %s637_s24  ;;  %p643_p12 = scmp.lt.s32.totalorder %s637_s24, %s637_s24 }
  0x3b   :  { %515 = vmatprep.mubr.bf16.mxu0 %v563_v4  ;;  %523 = vmatprep.mubr.bf16.mxu1 %v564_v5  ;;  %v566_v11 = vld [vmem:[#allocation3 + $0x28] sm:$0xff]   ;;  %v567_v12 = vld [vmem:[#allocation3 + $0x10] sm:$0xff]   ;;  %v569_v14 = vld [vmem:[#allocation3 + $0x18] sm:$0xff]  }
  0x3c   :  { %v568_v13 = vld [vmem:[#allocation3 + $0x30] sm:$0xff]   ;;  %v570_v15 = vld [vmem:[#allocation3 + $0x38] sm:$0xff]   ;;  %v385_v18 = vld [vmem:[#allocation8] sm:$0xff]  ;;  %p644_p13 = por %p643_p12, %p642_p11 }
  0x3d   :  { %502 = vmatpush3.bf16.msra.mxu0 %v556_v1  ;;  %540 = vmatpush3.bf16.msra.mxu1 %v556_v1  ;;  %v387_v16 = vld [vmem:[#allocation8 + $0x10] sm:$0xff]  ;;  %v393_v19 = vld [vmem:[#allocation8 + $0x40] sm:$0xff]  ;;  %v388_v20 = vld [vmem:[#allocation8 + $0x18] sm:$0xff]  ;;  %v401_v26 = vmul.f32 0.1, %v385_v18 }
  0x3e   :  { %503 = vmatprep.subr.bf16.mxu0 %v557_v2  ;;  %533 = vmatprep.subr.bf16.mxu1 %v557_v2  ;;  %v395_v17 = vld [vmem:[#allocation8 + $0x50] sm:$0xff]  ;;  %v396_v21 = vld [vmem:[#allocation8 + $0x58] sm:$0xff]  ;;  %v386_v22 = vld [vmem:[#allocation8 + $0x8] sm:$0xff]  ;;  %v403_v23 = vmul.f32 0.1, %v387_v16  ;;  %p645_p0 = pnand %p644_p13, %p638_p10 }
  0x3f   :  { %v394_v24 = vld [vmem:[#allocation8 + $0x48] sm:$0xff]  ;;  %v411_v25 = vmul.f32 0.1, %v395_v17  ;;  %v409_v27 = vmul.f32 0.1, %v393_v19  ;;  %v391_v34 = vld [vmem:[#allocation8 + $0x30] sm:$0xff] }
  0x40   :  { %v404_v28 = vmul.f32 0.1, %v388_v20  ;;  %v412_v29 = vmul.f32 0.1, %v396_v21  ;;  %v402_v30 = vmul.f32 0.1, %v386_v22 }
  0x41   :  { %504 = vmatpush3.bf16.msra.mxu0 %v557_v2  ;;  %541 = vmatpush3.bf16.msra.mxu1 %v557_v2  ;;  %v410_v33 = vmul.f32 0.1, %v394_v24  ;;  %v399_v35 = vld [vmem:[#allocation8 + $0x70] sm:$0xff]  ;;  %v389_v40 = vld [vmem:[#allocation8 + $0x20] sm:$0xff]  ;;  %v392_v46 = vld [vmem:[#allocation8 + $0x38] sm:$0xff] }
  0x42   :  { %505 = vmatprep.subr.bf16.mxu0 %v558_v3  ;;  %534 = vmatprep.subr.bf16.mxu1 %v558_v3  ;;  %v397_v41 = vld [vmem:[#allocation8 + $0x60] sm:$0xff]  ;;  %v400_v57 = vld [vmem:[#allocation8 + $0x78] sm:$0xff]  ;;  %v390_v58 = vld [vmem:[#allocation8 + $0x28] sm:$0xff]  ;;  %v407_v61 = vmul.f32 0.1, %v391_v34 }
  0x43   :  { %v415_v62 = vmul.f32 0.1, %v399_v35  ;;  %v398_v63 = vld [vmem:[#allocation8 + $0x68] sm:$0xff]  ;;  %v405_v2 = vmul.f32 0.1, %v389_v40 }
  0x44   :  { %v408_v4 = vmul.f32 0.1, %v392_v46  ;;  %v416_v5 = vmul.f32 0.1, %v400_v57 }
  0x45   :  { %506 = vmatpush3.bf16.msra.mxu0 %v558_v3  ;;  %542 = vmatpush3.bf16.msra.mxu1 %v558_v3  ;;  %v413_v3 = vmul.f32 0.1, %v397_v41 }
  0x46   :  { %507 = vmatprep.subr.bf16.mxu0 %v559_v6  ;;  %535 = vmatprep.subr.bf16.mxu1 %v559_v6 }
  0x49   :  { %508 = vmatpush3.bf16.msra.mxu0 %v559_v6  ;;  %543 = vmatpush3.bf16.msra.mxu1 %v559_v6  ;;  %v406_v6 = vmul.f32 0.1, %v390_v58 }
  0x4a   :  { %509 = vmatprep.subr.bf16.mxu0 %v560_v7  ;;  %536 = vmatprep.subr.bf16.mxu1 %v560_v7 }
  0x4d   :  { %510 = vmatpush3.bf16.msra.mxu0 %v560_v7  ;;  %544 = vmatpush3.bf16.msra.mxu1 %v560_v7 }
  0x4e   :  { %511 = vmatprep.subr.bf16.mxu0 %v561_v8  ;;  %537 = vmatprep.subr.bf16.mxu1 %v561_v8 }
  0x51   :  { %512 = vmatpush3.bf16.msra.mxu0 %v561_v8  ;;  %545 = vmatpush3.bf16.msra.mxu1 %v561_v8 }
  0x52   :  { %513 = vmatprep.subr.bf16.mxu0 %v562_v9  ;;  %538 = vmatprep.subr.bf16.mxu1 %v562_v9 }
  0x55   :  { %514 = vmatpush3.bf16.msra.mxu0 %v562_v9  ;;  %546 = vmatpush3.bf16.msra.mxu1 %v562_v9  ;;  %v414_v9 = vmul.f32 0.1, %v398_v63 }
  0x58   :  { %516 = vmatmul.mubr.bf16.vlgmr.msra.gmra.mrb[0].mxu0 %v565_v10  ;;  %524 = vmatmul.mubr.bf16.vlgmr.msra.gmra.mrb[0].mxu1 %v566_v11 }
  0x59   :  { %519 = vmatprep.mubr.bf16.mxu0 %v567_v12  ;;  %527 = vmatprep.mubr.bf16.mxu1 %v568_v13 }
  0x60   :  { %520 = vmatmul.mubr.bf16.gmra.mrb[4].mxu0 %v569_v14  ;;  %528 = vmatmul.mubr.bf16.gmra.mrb[4].mxu1 %v570_v15 }
 0x12b   :  { %v517_v31 = vpop.f32.mrb[0].mxu0  ;;  %v525_v32 = vpop.f32.mrb[0].mxu1 }
 0x12c   :  { %v371_v36 = vmul.f32 0.9, %v517_v31  ;;  %v379_v37 = vmul.f32 0.9, %v525_v32  ;;  %v255_v38 = vpop.f32.mrb[1].mxu0  ;;  %v287_v39 = vpop.f32.mrb[1].mxu1 }
 0x12d   :  { %v369_v42 = vmul.f32 0.9, %v255_v38  ;;  %v377_v43 = vmul.f32 0.9, %v287_v39  ;;  %v518_v44 = vpop.f32.mrb[2].mxu0  ;;  %v526_v45 = vpop.f32.mrb[2].mxu1 }
 0x12e   :  { %v419_v47 = vadd.f32 %v403_v23, %v371_v36  ;;  %v427_v48 = vadd.f32 %v411_v25, %v379_v37  ;;  %v372_v49 = vmul.f32 0.9, %v518_v44  ;;  %v380_v50 = vmul.f32 0.9, %v526_v45  ;;  %v258_v51 = vpop.f32.mrb[3].mxu0  ;;  %v290_v52 = vpop.f32.mrb[3].mxu1 }
 0x12f   :  { %v417_v53 = vadd.f32 %v401_v26, %v369_v42  ;;  %v425_v54 = vadd.f32 %v409_v27, %v377_v43  ;;  %v370_v55 = vmul.f32 0.9, %v258_v51  ;;  %v378_v56 = vmul.f32 0.9, %v290_v52 }
 0x130   :  { %435 = vst [vmem:[#allocation9 + $0x10] sm:$0xff] %v419_v47  ;;  %443 = vst [vmem:[#allocation9 + $0x50] sm:$0xff] %v427_v48  ;;  %v420_v59 = vadd.f32 %v404_v28, %v372_v49  ;;  %v428_v60 = vadd.f32 %v412_v29, %v380_v50 }
 0x131   :  { %433 = vst [vmem:[#allocation9] sm:$0xff] %v417_v53  ;;  %441 = vst [vmem:[#allocation9 + $0x40] sm:$0xff] %v425_v54  ;;  %v418_v0 = vadd.f32 %v402_v30, %v370_v55  ;;  %v426_v1 = vadd.f32 %v410_v33, %v378_v56 }
 0x132   :  { %436 = vst [vmem:[#allocation9 + $0x18] sm:$0xff] %v420_v59  ;;  %444 = vst [vmem:[#allocation9 + $0x58] sm:$0xff] %v428_v60 }
 0x133   :  { %434 = vst [vmem:[#allocation9 + $0x8] sm:$0xff] %v418_v0  ;;  %442 = vst [vmem:[#allocation9 + $0x48] sm:$0xff] %v426_v1  ;;  %v521_v7 = vpop.f32.mrb[4].mxu0  ;;  %v529_v8 = vpop.f32.mrb[4].mxu1 }
 0x134   :  { %v375_v10 = vmul.f32 0.9, %v521_v7  ;;  %v383_v11 = vmul.f32 0.9, %v529_v8  ;;  %v271_v12 = vpop.f32.mrb[5].mxu0  ;;  %v303_v13 = vpop.f32.mrb[5].mxu1 }
 0x135   :  { %v373_v14 = vmul.f32 0.9, %v271_v12  ;;  %v381_v15 = vmul.f32 0.9, %v303_v13  ;;  %v522_v16 = vpop.f32.mrb[6].mxu0  ;;  %v530_v17 = vpop.f32.mrb[6].mxu1 }
 0x136   :  { %v423_v18 = vadd.f32 %v407_v61, %v375_v10  ;;  %v431_v19 = vadd.f32 %v415_v62, %v383_v11  ;;  %v376_v20 = vmul.f32 0.9, %v522_v16  ;;  %v384_v21 = vmul.f32 0.9, %v530_v17  ;;  %v274_v22 = vpop.f32.mrb[7].mxu0  ;;  %v306_v23 = vpop.f32.mrb[7].mxu1 }
 0x137   :  { %v421_v24 = vadd.f32 %v405_v2, %v373_v14  ;;  %v429_v25 = vadd.f32 %v413_v3, %v381_v15  ;;  %v374_v26 = vmul.f32 0.9, %v274_v22  ;;  %v382_v27 = vmul.f32 0.9, %v306_v23 }
 0x138   :  { %439 = vst [vmem:[#allocation9 + $0x30] sm:$0xff] %v423_v18  ;;  %447 = vst [vmem:[#allocation9 + $0x70] sm:$0xff] %v431_v19  ;;  %v424_v28 = vadd.f32 %v408_v4, %v376_v20  ;;  %v432_v29 = vadd.f32 %v416_v5, %v384_v21 }
 0x139   :  { %437 = vst [vmem:[#allocation9 + $0x20] sm:$0xff] %v421_v24  ;;  %445 = vst [vmem:[#allocation9 + $0x60] sm:$0xff] %v429_v25  ;;  %v422_v30 = vadd.f32 %v406_v6, %v374_v26  ;;  %v430_v31 = vadd.f32 %v414_v9, %v382_v27 }
 0x13a   :  { %440 = vst [vmem:[#allocation9 + $0x38] sm:$0xff] %v424_v28  ;;  %448 = vst [vmem:[#allocation9 + $0x78] sm:$0xff] %v432_v29 }
 0x13b   :  { %438 = vst [vmem:[#allocation9 + $0x28] sm:$0xff] %v422_v30  ;;  %446 = vst [vmem:[#allocation9 + $0x68] sm:$0xff] %v430_v31 }
 0x13c   :  { %648 = shalt.err (!%p645_p0)
}
 0x13d   :  { %s649_s27 = scalar_lea.hbm %s757_s3, 2048 }
 0x13e   :  { %p650_p1 = scmp.ne.s32.totalorder %s757_s3, %s649_s27  ;;  %p653_p2 = scmp.lt.u32.totalorder %s649_s27, %s757_s3 }
 0x140   :  { %p655_p3 = pnand %p653_p2, %p650_p1 }
 0x142   :  { %658 = shalt.err (!%p655_p3)
}
 0x143   :  { %460 = dma.vmem_to_hbm [thread:$0]  %s455_s23, 2048, %s757_s3, [#allocation5], %s670_s0, %s670_s0, %s671_s15  }
 0x144   :  { %663 = dma.done.wait [#allocation5], 2048  }
 0x145   :  { %664 = vsyncadd [#allocation5], 4294965248 }
 0x146   :  { %464 = vsyncpa [#allocation4], 1 }
 0x147   :  { %465 = vsyncpa [#allocation7], 1 }
 0x148   :  { %466 = vsyncpa [#allocation5], 1 }

</bundles_post_ra>
